<compile_context>
chip_gen: v7x
topology: tpu7x:2x2x1
jax: 0.10.0
libtpu: 0.0.40
codegen_flags: <defaults>
</compile_context>

<pallas_src>
import functools

import jax
import jax.numpy as jnp
from jax.experimental import pallas as pl
from jax.experimental.pallas import tpu as pltpu

LANE = 128                 # TPU lane width; hidden/output dims are zero-padded to this
H1, H2, OUT = 30, 80, 2    # logical layer widths from the PyTorch module


def mlp_kernel(x_ref, w1_ref, b1_ref, w2_ref, b2_ref, w3_ref, b3_ref, o_ref):
    # Layer 1: Linear(F, 30 -> padded 128) + ReLU  (dropout = identity at inference)
    h1 = jnp.dot(x_ref[...], w1_ref[...], preferred_element_type=jnp.float32)
    h1 = jnp.maximum(h1 + b1_ref[...], 0.0)
    # Layer 2: Linear(30 -> 128, 80 -> padded 128) + ReLU
    h2 = jnp.dot(h1.astype(w2_ref.dtype), w2_ref[...],
                 preferred_element_type=jnp.float32)
    h2 = jnp.maximum(h2 + b2_ref[...], 0.0)
    # Layer 3: Linear(80 -> 128, 2 -> padded 128) -> lane-dense logits
    logits = jnp.dot(h2.astype(w3_ref.dtype), w3_ref[...],
                     preferred_element_type=jnp.float32)
    o_ref[...] = (logits + b3_ref[...]).astype(o_ref.dtype)


def _pad2d(a, rows, cols):
    """Zero-pad a 2-D array up to (rows, cols). Zeros keep padded lanes inert."""
    return jnp.pad(a, ((0, rows - a.shape[0]), (0, cols - a.shape[1])))


def _choose_block_b(B, F, target=512, budget_bytes=32 << 20):
    """Largest batch tile (multiple of 8) that fits the VMEM budget.

    Budget counts double-buffered x/out tiles plus double-buffered weight
    copies (f32, conservative). Small batches collapse to one grid step; large
    batches keep >= 2 grid steps so the parallel axis can use both v7x TCs.
    """
    itemsize = 4
    weight_bytes = 2 * (F * LANE + 2 * LANE * LANE + 3 * LANE) * itemsize
    per_row = 2 * (F + LANE) * itemsize          # dbl-buffered x row + out row
    cap = max(8, ((budget_bytes - weight_bytes) // per_row) // 8 * 8)
    blk = min(target, cap)
    if B <= blk:
        return max(8, pl.cdiv(B, 8) * 8)         # tiny batch: single grid step
    half = max(8, (pl.cdiv(B, 2) // 8) * 8)      # keep grid length >= 2 (v7x)
    return min(blk, half)


@functools.partial(jax.jit, static_argnames=("block_b", "use_bf16"))
def mlp_forward(x, w1, b1, w2, b2, w3, b3, *, block_b=None, use_bf16=False):
    B, F = x.shape
    assert w1.shape == (F, H1)
    assert w2.shape == (H1, H2)
    assert w3.shape == (H2, OUT)

    # Zero-pad hidden / output widths to 128 lanes (done once; weights are tiny).
    w1p = _pad2d(w1, F, LANE)
    b1p = _pad2d(b1.reshape(1, -1), 1, LANE)
    w2p = _pad2d(w2, LANE, LANE)
    b2p = _pad2d(b2.reshape(1, -1), 1, LANE)
    w3p = _pad2d(w3, LANE, LANE)
    b3p = _pad2d(b3.reshape(1, -1), 1, LANE)

    if use_bf16:
        # Halves the dominant HBM read of x; accumulation stays f32.
        x = x.astype(jnp.bfloat16)
        w1p = w1p.astype(jnp.bfloat16)
        w2p = w2p.astype(jnp.bfloat16)
        w3p = w3p.astype(jnp.bfloat16)

    blk = block_b if block_b is not None else _choose_block_b(B, F)
    B_pad = pl.cdiv(B, blk) * blk
    if B_pad != B:
        x = jnp.pad(x, ((0, B_pad - B), (0, 0)))   # padded rows sliced away below
    grid = (B_pad // blk,)

    # Raise the scoped VMEM limit only if the footprint needs it (v5e default
    # is 16 MiB); cap at 48 MiB so a v6e-sized tile cannot OOM v7x's 64 MiB VMEM.
    in_itemsize = 2 if use_bf16 else 4
    vmem_needed = (2 * blk * (F * in_itemsize + LANE * 4)
                   + 2 * (F * LANE + 2 * LANE * LANE) * in_itemsize
                   + 2 * 3 * LANE * 4)
    vmem_limit = None
    if vmem_needed > (16 << 20):
        vmem_limit = min(int(vmem_needed * 1.25), 48 << 20)

    # Batch is tiled across the grid; weights/biases are pinned to block (0,0)
    # and stay resident across all grid steps. (Their default double-buffered
    # copies are negligible at these sizes, so pipeline_mode is left default.)
    in_specs = [
        pl.BlockSpec((blk, F), lambda i: (i, 0)),      # x tile
        pl.BlockSpec((F, LANE), lambda i: (0, 0)),     # W1 (padded)
        pl.BlockSpec((1, LANE), lambda i: (0, 0)),     # b1
        pl.BlockSpec((LANE, LANE), lambda i: (0, 0)),  # W2
        pl.BlockSpec((1, LANE), lambda i: (0, 0)),     # b2
        pl.BlockSpec((LANE, LANE), lambda i: (0, 0)),  # W3
        pl.BlockSpec((1, LANE), lambda i: (0, 0)),     # b3
    ]
    out_specs = pl.BlockSpec((blk, LANE), lambda i: (i, 0))  # lane-dense output

    out = pl.pallas_call(
        mlp_kernel,
        out_shape=jax.ShapeDtypeStruct((B_pad, LANE), jnp.float32),
        grid_spec=pltpu.PrefetchScalarGridSpec(
            num_scalar_prefetch=0,
            grid=grid,
            in_specs=in_specs,
            out_specs=out_specs,
        ),
        compiler_params=pltpu.CompilerParams(
            dimension_semantics=("parallel",),
            vmem_limit_bytes=vmem_limit,
        ),
    )(x, w1p, b1p, w2p, b2p, w3p, b3p)

    return out[:B, :OUT]


def init_params(key, num_features):
    """Deterministic PyTorch-Linear-style init: U(-1/sqrt(fan_in), 1/sqrt(fan_in))."""
    dims = [(num_features, H1), (H1, H2), (H2, OUT)]
    params = []
    for (fan_in, fan_out) in dims:
        key, kw, kb = jax.random.split(key, 3)
        bound = 1.0 / jnp.sqrt(float(fan_in))
        w = jax.random.uniform(kw, (fan_in, fan_out), jnp.float32, -bound, bound)
        b = jax.random.uniform(kb, (1, fan_out), jnp.float32, -bound, bound)
        params += [w, b]
    return params


def reference_forward(x, w1, b1, w2, b2, w3, b3):
    h1 = jnp.maximum(x @ w1 + b1, 0.0)
    h2 = jnp.maximum(h1 @ w2 + b2, 0.0)
    return h2 @ w3 + b3


if __name__ == "__main__":
    key = jax.random.PRNGKey(0)
    batch, num_features = 200, 16   # small, and exercises batch padding/tiling

    kx, kp = jax.random.split(key)
    x = jax.random.normal(kx, (batch, num_features), dtype=jnp.float32)
    w1, b1, w2, b2, w3, b3 = init_params(kp, num_features)

    ref = reference_forward(x, w1, b1, w2, b2, w3, b3)

    # Default (auto) batch tile: whole batch in one grid step.
    logits = mlp_forward(x, w1, b1, w2, b2, w3, b3)
    logits = jax.block_until_ready(logits)
    assert logits.shape == (batch, OUT)
    assert jnp.allclose(logits, ref, atol=1e-5, rtol=1e-5), "mismatch (auto tile)"

    # Explicit smaller tile: multi-step grid + batch padding path.
    logits2 = mlp_forward(x, w1, b1, w2, b2, w3, b3, block_b=64)
    logits2 = jax.block_until_ready(logits2)
    assert logits2.shape == (batch, OUT)
    assert jnp.allclose(logits2, ref, atol=1e-5, rtol=1e-5), "mismatch (tiled)"

    print("KERNEL_OK")
</pallas_src>

<mosaic_0001>
module attributes {stable_mosaic.version = 11 : i64} {
  func.func @mlp_kernel(%arg0: i32, %arg1: memref<200x16xf32, #tpu.memory_space<vmem>>, %arg2: memref<16x128xf32, #tpu.memory_space<vmem>>, %arg3: memref<1x128xf32, #tpu.memory_space<vmem>>, %arg4: memref<128x128xf32, #tpu.memory_space<vmem>>, %arg5: memref<1x128xf32, #tpu.memory_space<vmem>>, %arg6: memref<128x128xf32, #tpu.memory_space<vmem>>, %arg7: memref<1x128xf32, #tpu.memory_space<vmem>>, %arg8: memref<200x128xf32, #tpu.memory_space<vmem>>) attributes {dimension_semantics = [#tpu.dimension_semantics<parallel>], iteration_bounds = array<i64: 1>, scalar_prefetch = 0 : i64, scratch_operands = 0 : i64, tpu.core_type = #tpu.core_type<tc>, window_params = [{transform_indices = @transform_0, window_bounds = array<i64: 200, 16>}, {pipeline_mode = #tpu.pipeline_mode<synchronous>, transform_indices = @transform_1, window_bounds = array<i64: 16, 128>}, {pipeline_mode = #tpu.pipeline_mode<synchronous>, transform_indices = @transform_2, window_bounds = array<i64: 1, 128>}, {pipeline_mode = #tpu.pipeline_mode<synchronous>, transform_indices = @transform_3, window_bounds = array<i64: 128, 128>}, {pipeline_mode = #tpu.pipeline_mode<synchronous>, transform_indices = @transform_4, window_bounds = array<i64: 1, 128>}, {pipeline_mode = #tpu.pipeline_mode<synchronous>, transform_indices = @transform_5, window_bounds = array<i64: 128, 128>}, {pipeline_mode = #tpu.pipeline_mode<synchronous>, transform_indices = @transform_6, window_bounds = array<i64: 1, 128>}, {transform_indices = @transform_7, window_bounds = array<i64: 200, 128>}]} {
    %c0 = arith.constant 0 : index
    %c0_0 = arith.constant 0 : index
    %0 = vector.load %arg1[%c0, %c0_0] : memref<200x16xf32, #tpu.memory_space<vmem>>, vector<200x16xf32>
    %c0_1 = arith.constant 0 : index
    %c0_2 = arith.constant 0 : index
    %1 = vector.load %arg2[%c0_1, %c0_2] : memref<16x128xf32, #tpu.memory_space<vmem>>, vector<16x128xf32>
    %cst = arith.constant dense<0.000000e+00> : vector<200x128xf32>
    %2 = tpu.matmul %0, %1, %cst {dimension_numbers = #tpu.dot_dimension_numbers<[1], [0], [0], [1], [0, 0, 1, 1], [], []>} : vector<200x16xf32>, vector<16x128xf32>, vector<200x128xf32> -> vector<200x128xf32>
    %c0_3 = arith.constant 0 : index
    %c0_4 = arith.constant 0 : index
    %3 = vector.load %arg3[%c0_3, %c0_4] : memref<1x128xf32, #tpu.memory_space<vmem>>, vector<1x128xf32>
    %4 = vector.broadcast %3 : vector<1x128xf32> to vector<200x128xf32>
    %5 = arith.addf %2, %4 : vector<200x128xf32>
    %cst_5 = arith.constant 0.000000e+00 : f32
    %6 = vector.broadcast %cst_5 : f32 to vector<200x128xf32>
    %7 = arith.maximumf %5, %6 : vector<200x128xf32>
    %c0_6 = arith.constant 0 : index
    %c0_7 = arith.constant 0 : index
    %8 = vector.load %arg4[%c0_6, %c0_7] : memref<128x128xf32, #tpu.memory_space<vmem>>, vector<128x128xf32>
    %cst_8 = arith.constant dense<0.000000e+00> : vector<200x128xf32>
    %9 = tpu.matmul %7, %8, %cst_8 {dimension_numbers = #tpu.dot_dimension_numbers<[1], [0], [0], [1], [0, 0, 1, 1], [], []>} : vector<200x128xf32>, vector<128x128xf32>, vector<200x128xf32> -> vector<200x128xf32>
    %c0_9 = arith.constant 0 : index
    %c0_10 = arith.constant 0 : index
    %10 = vector.load %arg5[%c0_9, %c0_10] : memref<1x128xf32, #tpu.memory_space<vmem>>, vector<1x128xf32>
    %11 = vector.broadcast %10 : vector<1x128xf32> to vector<200x128xf32>
    %12 = arith.addf %9, %11 : vector<200x128xf32>
    %cst_11 = arith.constant 0.000000e+00 : f32
    %13 = vector.broadcast %cst_11 : f32 to vector<200x128xf32>
    %14 = arith.maximumf %12, %13 : vector<200x128xf32>
    %c0_12 = arith.constant 0 : index
    %c0_13 = arith.constant 0 : index
    %15 = vector.load %arg6[%c0_12, %c0_13] : memref<128x128xf32, #tpu.memory_space<vmem>>, vector<128x128xf32>
    %cst_14 = arith.constant dense<0.000000e+00> : vector<200x128xf32>
    %16 = tpu.matmul %14, %15, %cst_14 {dimension_numbers = #tpu.dot_dimension_numbers<[1], [0], [0], [1], [0, 0, 1, 1], [], []>} : vector<200x128xf32>, vector<128x128xf32>, vector<200x128xf32> -> vector<200x128xf32>
    %c0_15 = arith.constant 0 : index
    %c0_16 = arith.constant 0 : index
    %17 = vector.load %arg7[%c0_15, %c0_16] : memref<1x128xf32, #tpu.memory_space<vmem>>, vector<1x128xf32>
    %18 = vector.broadcast %17 : vector<1x128xf32> to vector<200x128xf32>
    %19 = arith.addf %16, %18 : vector<200x128xf32>
    %c0_17 = arith.constant 0 : index
    %c0_18 = arith.constant 0 : index
    %20 = vector.load %arg8[%c0_17, %c0_18] : memref<200x128xf32, #tpu.memory_space<vmem>>, vector<200x128xf32>
    tpu.vector_store %arg8[%c0_17, %c0_18], %19 {strides = array<i32>} : memref<200x128xf32, #tpu.memory_space<vmem>>, vector<200x128xf32>,
    return
  }
  func.func @transform_0(%arg0: i32) -> (i32, i32) {
    %c0_i32 = arith.constant 0 : i32
    %c0_i32_0 = arith.constant 0 : i32
    return %arg0, %c0_i32 : i32, i32
  }
  func.func @transform_1(%arg0: i32) -> (i32, i32) {
    %c0_i32 = arith.constant 0 : i32
    %c0_i32_0 = arith.constant 0 : i32
    %c0_i32_1 = arith.constant 0 : i32
    return %c0_i32, %c0_i32_0 : i32, i32
  }
  func.func @transform_2(%arg0: i32) -> (i32, i32) {
    %c0_i32 = arith.constant 0 : i32
    %c0_i32_0 = arith.constant 0 : i32
    %c0_i32_1 = arith.constant 0 : i32
    return %c0_i32, %c0_i32_0 : i32, i32
  }
  func.func @transform_3(%arg0: i32) -> (i32, i32) {
    %c0_i32 = arith.constant 0 : i32
    %c0_i32_0 = arith.constant 0 : i32
    %c0_i32_1 = arith.constant 0 : i32
    return %c0_i32, %c0_i32_0 : i32, i32
  }
  func.func @transform_4(%arg0: i32) -> (i32, i32) {
    %c0_i32 = arith.constant 0 : i32
    %c0_i32_0 = arith.constant 0 : i32
    %c0_i32_1 = arith.constant 0 : i32
    return %c0_i32, %c0_i32_0 : i32, i32
  }
  func.func @transform_5(%arg0: i32) -> (i32, i32) {
    %c0_i32 = arith.constant 0 : i32
    %c0_i32_0 = arith.constant 0 : i32
    %c0_i32_1 = arith.constant 0 : i32
    return %c0_i32, %c0_i32_0 : i32, i32
  }
  func.func @transform_6(%arg0: i32) -> (i32, i32) {
    %c0_i32 = arith.constant 0 : i32
    %c0_i32_0 = arith.constant 0 : i32
    %c0_i32_1 = arith.constant 0 : i32
    return %c0_i32, %c0_i32_0 : i32, i32
  }
  func.func @transform_7(%arg0: i32) -> (i32, i32) {
    %c0_i32 = arith.constant 0 : i32
    %c0_i32_0 = arith.constant 0 : i32
    return %arg0, %c0_i32 : i32, i32
  }
}

</mosaic_0001>

<bundles_post_ra>
// kernel: mlp_forward.1
= control target key start
LH: loop header
LB: loop body
LE: loop exit
PB: predicated region body
PF: predicated region fallthrough
CT: control target
= control target key end

     0   :  { %v1317_v0 = vmov 0.0|0.0   ;;  %vm1318_vm0 = vmmov 0   ;;  %v1319_v3 = vmov 0.0   ;;  %vm60_vm1 = vcmask 130048   ;;  %s1922_s1 = inlined_call_operand.vmem [shape: f32[16,128], index: 1, kind: input, shape index: {}]   ;;  %s1923_s0 = inlined_call_operand.vmem [shape: f32[200,16], index: 0, kind: input, shape index: {}]   ;;  %s1924_s3 = inlined_call_operand.vmem [shape: f32[128,128], index: 3, kind: input, shape index: {}]   ;;  %s1925_s5 = inlined_call_operand.vmem [shape: f32[128,128], index: 5, kind: input, shape index: {}]   ;;  %s1926_s2 = inlined_call_operand.vmem [shape: f32[1,128], index: 2, kind: input, shape index: {}]   ;;  %s1927_s4 = inlined_call_operand.vmem [shape: f32[1,128], index: 4, kind: input, shape index: {}]   ;;  %s1928_s6 = inlined_call_operand.vmem [shape: f32[1,128], index: 6, kind: input, shape index: {}]   ;;  %s1929_s7 = inlined_call_operand.vmem [shape: f32[200,128], index: 7, kind: output, shape index: {}]  }
   0x1   :  { %1261 = vmatprep.subr.bf16.mxu0 %v1317_v0  ;;  %v51_v1 = vld [vmem:[%s1922_s1] sm:$0xff]  ;;  %v52_v2 = vld [vmem:[%s1922_s1 + $0x8] sm:$0xff]  ;;  %972 = vmatprep.mubr.msk.f32.mxu0 %vm1318_vm0, %v1319_v3  ;;  %v40_v8 = vld [vmem:[%s1923_s0 + $0x70] sm:$0xff] }
   0x2   :  { %v1262_v4 = vpack.c.bf16 %v52_v2, %v51_v1  ;;  %1312 = vmatprep.subr.bf16.mxu1 %v1317_v0  ;;  %1011 = vmatprep.mubr.msk.f32.mxu1 %vm1318_vm0, %v1319_v3  ;;  %v26_v5 = vld [vmem:[%s1923_s0] sm:$0xff]  ;;  %v39_v6 = vld [vmem:[%s1923_s0 + $0x68] sm:$0xff]  ;;  %v353_v11 = vld [vmem:[%s1924_s3 + $0x10] sm:$0xff] }
   0x3   :  { %v27_v7 = vld [vmem:[%s1923_s0 + $0x8] sm:$0xff]  ;;  %v351_v9 = vld [vmem:[%s1924_s3] sm:$0xff]  ;;  %v354_v13 = vld [vmem:[%s1924_s3 + $0x18] sm:$0xff] }
   0x4   :  { %1263 = vmatpush3.bf16.msra.mxu0 %v1262_v4  ;;  %1313 = vmatpush3.bf16.msra.mxu1 %v1262_v4  ;;  %v352_v10 = vld [vmem:[%s1924_s3 + $0x8] sm:$0xff]  ;;  %v28_v14 = vld [vmem:[%s1923_s0 + $0x10] sm:$0xff]  ;;  %v41_v15 = vld [vmem:[%s1923_s0 + $0x78] sm:$0xff]  ;;  %v1268_v16 = vpack.c.bf16 %v354_v13, %v353_v11 }
   0x5   :  { %1264 = vmatprep.subr.bf16.mxu1 %v1317_v0  ;;  %1288 = vmatprep.subr.bf16.mxu0 %v1317_v0  ;;  %v1265_v12 = vpack.c.bf16 %v352_v10, %v351_v9  ;;  %v355_v17 = vld [vmem:[%s1924_s3 + $0x20] sm:$0xff]  ;;  %v356_v18 = vld [vmem:[%s1924_s3 + $0x28] sm:$0xff]  ;;  %v29_v19 = vld [vmem:[%s1923_s0 + $0x18] sm:$0xff] }
   0x6   :  { %v42_v20 = vld [vmem:[%s1923_s0 + $0x80] sm:$0xff]  ;;  %v1271_v21 = vpack.c.bf16 %v356_v18, %v355_v17  ;;  %v357_v22 = vld [vmem:[%s1924_s3 + $0x30] sm:$0xff]  ;;  %v358_v23 = vld [vmem:[%s1924_s3 + $0x38] sm:$0xff] }
   0x7   :  { %973 = vmatmul.mubr.msk.f32.vlgmr.msra.gmra.mrb[0].mxu0 %vm60_vm1, %v26_v5  ;;  %1012 = vmatmul.mubr.msk.f32.vlgmr.msra.gmra.mrb[0].mxu1 %vm60_vm1, %v39_v6  ;;  %v30_v24 = vld [vmem:[%s1923_s0 + $0x20] sm:$0xff]  ;;  %v43_v25 = vld [vmem:[%s1923_s0 + $0x88] sm:$0xff]  ;;  %v1274_v26 = vpack.c.bf16 %v358_v23, %v357_v22  ;;  %v44_v30 = vld [vmem:[%s1923_s0 + $0x90] sm:$0xff] }
   0x8   :  { %975 = vmatprep.mubr.msk.f32.mxu0 %vm1318_vm0, %v1319_v3  ;;  %1014 = vmatprep.mubr.msk.f32.mxu1 %vm1318_vm0, %v1319_v3  ;;  %v359_v27 = vld [vmem:[%s1924_s3 + $0x40] sm:$0xff]  ;;  %v360_v28 = vld [vmem:[%s1924_s3 + $0x48] sm:$0xff]  ;;  %v361_v32 = vld [vmem:[%s1924_s3 + $0x50] sm:$0xff] }
   0x9   :  { %1266 = vmatpush3.bf16.msra.mxu1 %v1265_v12  ;;  %v31_v29 = vld [vmem:[%s1923_s0 + $0x28] sm:$0xff]  ;;  %v1277_v31 = vpack.c.bf16 %v360_v28, %v359_v27  ;;  %v362_v33 = vld [vmem:[%s1924_s3 + $0x58] sm:$0xff]  ;;  %v32_v34 = vld [vmem:[%s1923_s0 + $0x30] sm:$0xff] }
   0xa   :  { %1267 = vmatprep.subr.bf16.mxu1 %v1317_v0  ;;  %v45_v35 = vld [vmem:[%s1923_s0 + $0x98] sm:$0xff]  ;;  %v1280_v36 = vpack.c.bf16 %v362_v33, %v361_v32  ;;  %v363_v37 = vld [vmem:[%s1924_s3 + $0x60] sm:$0xff]  ;;  %v364_v38 = vld [vmem:[%s1924_s3 + $0x68] sm:$0xff] }
   0xb   :  { %976 = vmatmul.mubr.msk.f32.gmra.mrb[2].mxu0 %vm60_vm1, %v27_v7  ;;  %1015 = vmatmul.mubr.msk.f32.gmra.mrb[2].mxu1 %vm60_vm1, %v40_v8  ;;  %v33_v39 = vld [vmem:[%s1923_s0 + $0x38] sm:$0xff]  ;;  %v46_v40 = vld [vmem:[%s1923_s0 + $0xa0] sm:$0xff]  ;;  %v1283_v41 = vpack.c.bf16 %v364_v38, %v363_v37  ;;  %v365_v42 = vld [vmem:[%s1924_s3 + $0x70] sm:$0xff] }
   0xc   :  { %978 = vmatprep.mubr.msk.f32.mxu0 %vm1318_vm0, %v1319_v3  ;;  %1017 = vmatprep.mubr.msk.f32.mxu1 %vm1318_vm0, %v1319_v3  ;;  %v366_v43 = vld [vmem:[%s1924_s3 + $0x78] sm:$0xff]  ;;  %v34_v44 = vld [vmem:[%s1923_s0 + $0x40] sm:$0xff]  ;;  %v47_v45 = vld [vmem:[%s1923_s0 + $0xa8] sm:$0xff] }
   0xd   :  { %1269 = vmatpush3.bf16.msra.mxu1 %v1268_v16  ;;  %v1286_v46 = vpack.c.bf16 %v366_v43, %v365_v42  ;;  %v35_v47 = vld [vmem:[%s1923_s0 + $0x48] sm:$0xff]  ;;  %v48_v48 = vld [vmem:[%s1923_s0 + $0xb0] sm:$0xff]  ;;  %v49_v50 = vld [vmem:[%s1923_s0 + $0xb8] sm:$0xff] }
   0xe   :  { %1270 = vmatprep.subr.bf16.mxu1 %v1317_v0  ;;  %v36_v49 = vld [vmem:[%s1923_s0 + $0x50] sm:$0xff]  ;;  %v37_v51 = vld [vmem:[%s1923_s0 + $0x58] sm:$0xff]  ;;  %v50_v52 = vld [vmem:[%s1923_s0 + $0xc0] sm:$0xff] }
   0xf   :  { %979 = vmatmul.mubr.msk.f32.gmra.mrb[4].mxu0 %vm60_vm1, %v28_v14  ;;  %1018 = vmatmul.mubr.msk.f32.gmra.mrb[4].mxu1 %vm60_vm1, %v41_v15  ;;  %v38_v53 = vld [vmem:[%s1923_s0 + $0x60] sm:$0xff]  ;;  %v590_v55 = vld [vmem:[%s1925_s5 + $0x8] sm:$0xff]  ;;  %v591_v56 = vld [vmem:[%s1925_s5 + $0x10] sm:$0xff] }
  0x10   :  { %981 = vmatprep.mubr.msk.f32.mxu0 %vm1318_vm0, %v1319_v3  ;;  %1020 = vmatprep.mubr.msk.f32.mxu1 %vm1318_vm0, %v1319_v3  ;;  %v589_v54 = vld [vmem:[%s1925_s5] sm:$0xff]  ;;  %v592_v58 = vld [vmem:[%s1925_s5 + $0x18] sm:$0xff]  ;;  %v594_v61 = vld [vmem:[%s1925_s5 + $0x28] sm:$0xff] }
  0x11   :  { %1272 = vmatpush3.bf16.msra.mxu1 %v1271_v21  ;;  %v1289_v57 = vpack.c.bf16 %v590_v55, %v589_v54  ;;  %v1292_v59 = vpack.c.bf16 %v592_v58, %v591_v56  ;;  %v593_v60 = vld [vmem:[%s1925_s5 + $0x20] sm:$0xff]  ;;  %v595_v63 = vld [vmem:[%s1925_s5 + $0x30] sm:$0xff]  ;;  %v596_v1 = vld [vmem:[%s1925_s5 + $0x38] sm:$0xff] }
  0x12   :  { %1273 = vmatprep.subr.bf16.mxu1 %v1317_v0  ;;  %v1295_v62 = vpack.c.bf16 %v594_v61, %v593_v60  ;;  %v1298_v2 = vpack.c.bf16 %v596_v1, %v595_v63  ;;  %v597_v4 = vld [vmem:[%s1925_s5 + $0x40] sm:$0xff]  ;;  %v598_v5 = vld [vmem:[%s1925_s5 + $0x48] sm:$0xff]  ;;  %v599_v7 = vld [vmem:[%s1925_s5 + $0x50] sm:$0xff] }
  0x13   :  { %982 = vmatmul.mubr.msk.f32.gmra.mrb[6].mxu0 %vm60_vm1, %v29_v19  ;;  %1021 = vmatmul.mubr.msk.f32.gmra.mrb[6].mxu1 %vm60_vm1, %v42_v20  ;;  %v1301_v6 = vpack.c.bf16 %v598_v5, %v597_v4  ;;  %v600_v8 = vld [vmem:[%s1925_s5 + $0x58] sm:$0xff]  ;;  %v601_v10 = vld [vmem:[%s1925_s5 + $0x60] sm:$0xff]  ;;  %v602_v11 = vld [vmem:[%s1925_s5 + $0x68] sm:$0xff] }
  0x14   :  { %984 = vmatprep.mubr.msk.f32.mxu0 %vm1318_vm0, %v1319_v3  ;;  %1023 = vmatprep.mubr.msk.f32.mxu1 %vm1318_vm0, %v1319_v3  ;;  %v1304_v9 = vpack.c.bf16 %v600_v8, %v599_v7  ;;  %v1307_v12 = vpack.c.bf16 %v602_v11, %v601_v10  ;;  %v1629_v13 = vld [vmem:[%s1926_s2] ss:$0 sm:$0xff]  ;;  %v603_v14 = vld [vmem:[%s1925_s5 + $0x70] sm:$0xff]  ;;  %v604_v15 = vld [vmem:[%s1925_s5 + $0x78] sm:$0xff] }
  0x15   :  { %1275 = vmatpush3.bf16.msra.mxu1 %v1274_v26  ;;  %1290 = vmatpush3.bf16.msra.mxu0 %v1289_v57  ;;  %v1310_v21 = vpack.c.bf16 %v604_v15, %v603_v14 }
  0x16   :  { %1276 = vmatprep.subr.bf16.mxu1 %v1317_v0  ;;  %1291 = vmatprep.subr.bf16.mxu0 %v1317_v0 }
  0x17   :  { %985 = vmatmul.mubr.msk.f32.gmra.mrb[8].mxu0 %vm60_vm1, %v30_v24  ;;  %1024 = vmatmul.mubr.msk.f32.gmra.mrb[8].mxu1 %vm60_vm1, %v43_v25 }
  0x18   :  { %987 = vmatprep.mubr.msk.f32.mxu0 %vm1318_vm0, %v1319_v3  ;;  %1026 = vmatprep.mubr.msk.f32.mxu1 %vm1318_vm0, %v1319_v3 }
  0x19   :  { %1278 = vmatpush3.bf16.msra.mxu1 %v1277_v31  ;;  %1293 = vmatpush3.bf16.msra.mxu0 %v1292_v59 }
  0x1a   :  { %1279 = vmatprep.subr.bf16.mxu1 %v1317_v0  ;;  %1294 = vmatprep.subr.bf16.mxu0 %v1317_v0 }
  0x1b   :  { %988 = vmatmul.mubr.msk.f32.gmra.mrb[10].mxu0 %vm60_vm1, %v31_v29  ;;  %1027 = vmatmul.mubr.msk.f32.gmra.mrb[10].mxu1 %vm60_vm1, %v44_v30 }
  0x1c   :  { %990 = vmatprep.mubr.msk.f32.mxu0 %vm1318_vm0, %v1319_v3  ;;  %1029 = vmatprep.mubr.msk.f32.mxu1 %vm1318_vm0, %v1319_v3 }
  0x1d   :  { %1281 = vmatpush3.bf16.msra.mxu1 %v1280_v36  ;;  %1296 = vmatpush3.bf16.msra.mxu0 %v1295_v62 }
  0x1e   :  { %1282 = vmatprep.subr.bf16.mxu1 %v1317_v0  ;;  %1297 = vmatprep.subr.bf16.mxu0 %v1317_v0 }
  0x1f   :  { %991 = vmatmul.mubr.msk.f32.gmra.mrb[12].mxu0 %vm60_vm1, %v32_v34  ;;  %1030 = vmatmul.mubr.msk.f32.gmra.mrb[12].mxu1 %vm60_vm1, %v45_v35 }
  0x20   :  { %993 = vmatprep.mubr.msk.f32.mxu0 %vm1318_vm0, %v1319_v3  ;;  %1032 = vmatprep.mubr.msk.f32.mxu1 %vm1318_vm0, %v1319_v3 }
  0x21   :  { %1284 = vmatpush3.bf16.msra.mxu1 %v1283_v41  ;;  %1299 = vmatpush3.bf16.msra.mxu0 %v1298_v2 }
  0x22   :  { %1285 = vmatprep.subr.bf16.mxu1 %v1317_v0  ;;  %1300 = vmatprep.subr.bf16.mxu0 %v1317_v0 }
  0x23   :  { %994 = vmatmul.mubr.msk.f32.gmra.mrb[14].mxu0 %vm60_vm1, %v33_v39  ;;  %1033 = vmatmul.mubr.msk.f32.gmra.mrb[14].mxu1 %vm60_vm1, %v46_v40 }
  0x24   :  { %996 = vmatprep.mubr.msk.f32.mxu0 %vm1318_vm0, %v1319_v3  ;;  %1035 = vmatprep.mubr.msk.f32.mxu1 %vm1318_vm0, %v1319_v3 }
  0x25   :  { %1287 = vmatpush3.bf16.msra.mxu1 %v1286_v46  ;;  %1302 = vmatpush3.bf16.msra.mxu0 %v1301_v6 }
  0x26   :  { %1303 = vmatprep.subr.bf16.mxu0 %v1317_v0 }
  0x27   :  { %997 = vmatmul.mubr.msk.f32.gmra.mrb[16].mxu0 %vm60_vm1, %v34_v44  ;;  %1036 = vmatmul.mubr.msk.f32.gmra.mrb[16].mxu1 %vm60_vm1, %v47_v45 }
  0x28   :  { %999 = vmatprep.mubr.msk.f32.mxu0 %vm1318_vm0, %v1319_v3  ;;  %1038 = vmatprep.mubr.msk.f32.mxu1 %vm1318_vm0, %v1319_v3 }
  0x29   :  { %1305 = vmatpush3.bf16.msra.mxu0 %v1304_v9 }
  0x2a   :  { %1306 = vmatprep.subr.bf16.mxu0 %v1317_v0 }
  0x2b   :  { %1000 = vmatmul.mubr.msk.f32.gmra.mrb[18].mxu0 %vm60_vm1, %v35_v47  ;;  %1039 = vmatmul.mubr.msk.f32.gmra.mrb[18].mxu1 %vm60_vm1, %v48_v48 }
  0x2c   :  { %1002 = vmatprep.mubr.msk.f32.mxu0 %vm1318_vm0, %v1319_v3  ;;  %1041 = vmatprep.mubr.msk.f32.mxu1 %vm1318_vm0, %v1319_v3 }
  0x2d   :  { %1308 = vmatpush3.bf16.msra.mxu0 %v1307_v12 }
  0x2e   :  { %1309 = vmatprep.subr.bf16.mxu0 %v1317_v0 }
  0x2f   :  { %1003 = vmatmul.mubr.msk.f32.gmra.mrb[20].mxu0 %vm60_vm1, %v36_v49  ;;  %1042 = vmatmul.mubr.msk.f32.gmra.mrb[20].mxu1 %vm60_vm1, %v49_v50 }
  0x30   :  { %1005 = vmatprep.mubr.msk.f32.mxu0 %vm1318_vm0, %v1319_v3  ;;  %1044 = vmatprep.mubr.msk.f32.mxu1 %vm1318_vm0, %v1319_v3 }
  0x31   :  { %1311 = vmatpush3.bf16.msra.mxu0 %v1310_v21 }
  0x33   :  { %1006 = vmatmul.mubr.msk.f32.gmra.mrb[22].mxu0 %vm60_vm1, %v37_v51  ;;  %1045 = vmatmul.mubr.msk.f32.gmra.mrb[22].mxu1 %vm60_vm1, %v50_v52 }
  0x34   :  { %1008 = vmatprep.mubr.msk.f32.mxu0 %vm1318_vm0, %v1319_v3  ;;  %1079 = vmatprep.mubr.msk.f32.mxu1 %vm1318_vm0, %v1319_v3 }
  0x37   :  { %1009 = vmatmul.mubr.msk.f32.gmra.mrb[24].mxu0 %vm60_vm1, %v38_v53 }
  0x38   :  { %1186 = vmatprep.mubr.msk.f32.mxu0 %vm1318_vm0, %v1319_v3 }
  0xda   :  { %v202_v16 = vpop.f32.mrb[0].mxu0  ;;  %v1638_v17 = vpop.f32.mrb[0].mxu1 }
  0xdb   :  { %v203_v18 = vadd.f32 %v1629_v13, %v202_v16  ;;  %v974_v19 = vpop.f32.mrb[1].mxu0  ;;  %v1013_v20 = vpop.f32.mrb[1].mxu1 }
  0xdd   :  { %v326_v22 = vmax.f32 %v203_v18, 0.0 }
  0xde   :  { %v207_v23 = vpop.f32.mrb[2].mxu0  ;;  %v1642_v24 = vpop.f32.mrb[2].mxu1 }
  0xdf   :  { %v208_v25 = vadd.f32 %v1629_v13, %v207_v23  ;;  %v977_v26 = vpop.f32.mrb[3].mxu0  ;;  %1080 = vmatmul.mubr.f32.vlgmr.msra.gmra.mrb[24].mxu1 %v326_v22  ;;  %v1016_v27 = vpop.f32.mrb[3].mxu1 }
  0xe0   :  { %1082 = vmatprep.mubr.msk.f32.mxu1 %vm1318_vm0, %v1319_v3 }
  0xe1   :  { %v327_v28 = vmax.f32 %v208_v25, 0.0 }
  0xe2   :  { %v212_v29 = vpop.f32.mrb[4].mxu0  ;;  %v1647_v30 = vpop.f32.mrb[4].mxu1 }
  0xe3   :  { %v213_v31 = vadd.f32 %v1629_v13, %v212_v29  ;;  %v980_v0 = vpop.f32.mrb[5].mxu0  ;;  %1083 = vmatmul.mubr.f32.gmra.mrb[26].mxu1 %v327_v28  ;;  %v1019_v32 = vpop.f32.mrb[5].mxu1 }
  0xe4   :  { %1085 = vmatprep.mubr.msk.f32.mxu1 %vm1318_vm0, %v1319_v3 }
  0xe5   :  { %v328_v33 = vmax.f32 %v213_v31, 0.0 }
  0xe6   :  { %v217_v34 = vpop.f32.mrb[6].mxu0  ;;  %v282_v35 = vpop.f32.mrb[6].mxu1 }
  0xe7   :  { %v218_v36 = vadd.f32 %v1629_v13, %v217_v34  ;;  %v983_v37 = vpop.f32.mrb[7].mxu0  ;;  %1086 = vmatmul.mubr.f32.gmra.mrb[28].mxu1 %v328_v33  ;;  %v1654_v38 = vadd.f32 %v1629_v13, %v282_v35  ;;  %v1022_v39 = vpop.f32.mrb[7].mxu1 }
  0xe8   :  { %1088 = vmatprep.mubr.msk.f32.mxu1 %vm1318_vm0, %v1319_v3 }
  0xe9   :  { %v329_v40 = vmax.f32 %v218_v36, 0.0 }
  0xea   :  { %v222_v41 = vpop.f32.mrb[8].mxu0  ;;  %v287_v42 = vpop.f32.mrb[8].mxu1 }
  0xeb   :  { %v223_v43 = vadd.f32 %v1629_v13, %v222_v41  ;;  %v986_v44 = vpop.f32.mrb[9].mxu0  ;;  %1089 = vmatmul.mubr.f32.gmra.mrb[30].mxu1 %v329_v40  ;;  %v1660_v45 = vadd.f32 %v1629_v13, %v287_v42  ;;  %v1025_v46 = vpop.f32.mrb[9].mxu1  ;;  %v268_v42 = vadd.f32 %v1629_v13, %v1638_v17 }
  0xec   :  { %1091 = vmatprep.mubr.msk.f32.mxu1 %vm1318_vm0, %v1319_v3  ;;  %v273_v46 = vadd.f32 %v1629_v13, %v1642_v24 }
  0xed   :  { %v330_v47 = vmax.f32 %v223_v43, 0.0  ;;  %v339_v44 = vmax.f32 %v268_v42, 0.0  ;;  %v343_v24 = vmax.f32 %v1660_v45, 0.0 }
  0xee   :  { %v227_v48 = vpop.f32.mrb[10].mxu0  ;;  %v292_v49 = vpop.f32.mrb[10].mxu1 }
  0xef   :  { %v228_v50 = vadd.f32 %v1629_v13, %v227_v48  ;;  %v989_v51 = vpop.f32.mrb[11].mxu0  ;;  %1092 = vmatmul.mubr.f32.gmra.mrb[32].mxu1 %v330_v47  ;;  %v1666_v52 = vadd.f32 %v1629_v13, %v292_v49  ;;  %v1028_v53 = vpop.f32.mrb[11].mxu1  ;;  %v340_v47 = vmax.f32 %v273_v46, 0.0  ;;  %v278_v48 = vadd.f32 %v1629_v13, %v1647_v30 }
  0xf0   :  { %1094 = vmatprep.mubr.msk.f32.mxu1 %vm1318_vm0, %v1319_v3  ;;  %v342_v49 = vmax.f32 %v1654_v38, 0.0  ;;  %v1742_v53 = vld [vmem:[%s1927_s4] ss:$0 sm:$0xff] }
  0xf1   :  { %v331_v54 = vmax.f32 %v228_v50, 0.0  ;;  %v341_v17 = vmax.f32 %v278_v48, 0.0 }
  0xf2   :  { %v232_v55 = vpop.f32.mrb[12].mxu0  ;;  %v297_v56 = vpop.f32.mrb[12].mxu1 }
  0xf3   :  { %v233_v57 = vadd.f32 %v1629_v13, %v232_v55  ;;  %v992_v58 = vpop.f32.mrb[13].mxu0  ;;  %1095 = vmatmul.mubr.f32.gmra.mrb[34].mxu1 %v331_v54  ;;  %v1672_v59 = vadd.f32 %v1629_v13, %v297_v56  ;;  %v1031_v60 = vpop.f32.mrb[13].mxu1 }
  0xf4   :  { %1097 = vmatprep.mubr.msk.f32.mxu1 %vm1318_vm0, %v1319_v3 }
  0xf5   :  { %v332_v61 = vmax.f32 %v233_v57, 0.0  ;;  %v345_v30 = vmax.f32 %v1672_v59, 0.0 }
  0xf6   :  { %v237_v62 = vpop.f32.mrb[14].mxu0  ;;  %v302_v63 = vpop.f32.mrb[14].mxu1 }
  0xf7   :  { %v238_v1 = vadd.f32 %v1629_v13, %v237_v62  ;;  %v995_v2 = vpop.f32.mrb[15].mxu0  ;;  %1098 = vmatmul.mubr.f32.gmra.mrb[36].mxu1 %v332_v61  ;;  %v1678_v4 = vadd.f32 %v1629_v13, %v302_v63  ;;  %v1034_v5 = vpop.f32.mrb[15].mxu1 }
  0xf8   :  { %1100 = vmatprep.mubr.msk.f32.mxu1 %vm1318_vm0, %v1319_v3 }
  0xf9   :  { %v333_v6 = vmax.f32 %v238_v1, 0.0  ;;  %v346_v38 = vmax.f32 %v1678_v4, 0.0 }
  0xfa   :  { %v242_v7 = vpop.f32.mrb[16].mxu0  ;;  %v307_v8 = vpop.f32.mrb[16].mxu1 }
  0xfb   :  { %v243_v9 = vadd.f32 %v1629_v13, %v242_v7  ;;  %v998_v10 = vpop.f32.mrb[17].mxu0  ;;  %1101 = vmatmul.mubr.f32.gmra.mrb[38].mxu1 %v333_v6  ;;  %v1684_v11 = vadd.f32 %v1629_v13, %v307_v8  ;;  %v1037_v12 = vpop.f32.mrb[17].mxu1 }
  0xfc   :  { %1103 = vmatprep.mubr.msk.f32.mxu1 %vm1318_vm0, %v1319_v3 }
  0xfd   :  { %v334_v14 = vmax.f32 %v243_v9, 0.0  ;;  %v347_v45 = vmax.f32 %v1684_v11, 0.0 }
  0xfe   :  { %v247_v15 = vpop.f32.mrb[18].mxu0  ;;  %v312_v16 = vpop.f32.mrb[18].mxu1 }
  0xff   :  { %v248_v18 = vadd.f32 %v1629_v13, %v247_v15  ;;  %v1001_v19 = vpop.f32.mrb[19].mxu0  ;;  %1104 = vmatmul.mubr.f32.gmra.mrb[40].mxu1 %v334_v14  ;;  %v313_v20 = vadd.f32 %v1629_v13, %v312_v16  ;;  %v1040_v21 = vpop.f32.mrb[19].mxu1 }
 0x100   :  { %1106 = vmatprep.mubr.msk.f32.mxu1 %vm1318_vm0, %v1319_v3 }
 0x101   :  { %v335_v22 = vmax.f32 %v248_v18, 0.0  ;;  %v348_v50 = vmax.f32 %v313_v20, 0.0 }
 0x102   :  { %v252_v23 = vpop.f32.mrb[20].mxu0  ;;  %v317_v25 = vpop.f32.mrb[20].mxu1 }
 0x103   :  { %v253_v26 = vadd.f32 %v1629_v13, %v252_v23  ;;  %v1004_v27 = vpop.f32.mrb[21].mxu0  ;;  %1107 = vmatmul.mubr.f32.gmra.mrb[42].mxu1 %v335_v22  ;;  %v318_v28 = vadd.f32 %v1629_v13, %v317_v25  ;;  %v1043_v29 = vpop.f32.mrb[21].mxu1 }
 0x104   :  { %1109 = vmatprep.mubr.msk.f32.mxu1 %vm1318_vm0, %v1319_v3 }
 0x105   :  { %v336_v31 = vmax.f32 %v253_v26, 0.0  ;;  %v349_v51 = vmax.f32 %v318_v28, 0.0 }
 0x106   :  { %v257_v0 = vpop.f32.mrb[22].mxu0  ;;  %v322_v32 = vpop.f32.mrb[22].mxu1 }
 0x107   :  { %v258_v33 = vadd.f32 %v1629_v13, %v257_v0  ;;  %v1007_v34 = vpop.f32.mrb[23].mxu0  ;;  %1110 = vmatmul.mubr.f32.gmra.mrb[44].mxu1 %v336_v31  ;;  %v323_v35 = vadd.f32 %v1629_v13, %v322_v32  ;;  %v1046_v36 = vpop.f32.mrb[23].mxu1 }
 0x108   :  { %1112 = vmatprep.mubr.msk.f32.mxu1 %vm1318_vm0, %v1319_v3 }
 0x109   :  { %v337_v37 = vmax.f32 %v258_v33, 0.0 }
 0x10a   :  { %v262_v39 = vpop.f32.mrb[24].mxu0 }
 0x10b   :  { %v263_v40 = vadd.f32 %v1629_v13, %v262_v39  ;;  %v1010_v41 = vpop.f32.mrb[25].mxu0  ;;  %1113 = vmatmul.mubr.f32.gmra.mrb[46].mxu1 %v337_v37  ;;  %v344_v13 = vmax.f32 %v1666_v52, 0.0  ;;  %v350_v52 = vmax.f32 %v323_v35, 0.0 }
 0x10c   :  { %1115 = vmatprep.mubr.msk.f32.mxu1 %vm1318_vm0, %v1319_v3 }
 0x10d   :  { %v338_v43 = vmax.f32 %v263_v40, 0.0 }
 0x10f   :  { %1116 = vmatmul.mubr.f32.gmra.mrb[48].mxu1 %v338_v43 }
 0x110   :  { %1118 = vmatprep.mubr.msk.f32.mxu1 %vm1318_vm0, %v1319_v3 }
 0x113   :  { %1119 = vmatmul.mubr.f32.gmra.mrb[50].mxu1 %v339_v44 }
 0x114   :  { %1121 = vmatprep.mubr.msk.f32.mxu1 %vm1318_vm0, %v1319_v3 }
 0x117   :  { %1122 = vmatmul.mubr.f32.gmra.mrb[52].mxu1 %v340_v47 }
 0x118   :  { %1124 = vmatprep.mubr.msk.f32.mxu1 %vm1318_vm0, %v1319_v3 }
 0x11b   :  { %1125 = vmatmul.mubr.f32.gmra.mrb[54].mxu1 %v341_v17 }
 0x11c   :  { %1127 = vmatprep.mubr.msk.f32.mxu1 %vm1318_vm0, %v1319_v3 }
 0x11f   :  { %1128 = vmatmul.mubr.f32.gmra.mrb[56].mxu1 %v342_v49 }
 0x120   :  { %1130 = vmatprep.mubr.msk.f32.mxu1 %vm1318_vm0, %v1319_v3 }
 0x123   :  { %1131 = vmatmul.mubr.f32.gmra.mrb[58].mxu1 %v343_v24 }
 0x124   :  { %1133 = vmatprep.mubr.msk.f32.mxu1 %vm1318_vm0, %v1319_v3 }
 0x127   :  { %1134 = vmatmul.mubr.f32.gmra.mrb[60].mxu1 %v344_v13 }
 0x128   :  { %1136 = vmatprep.mubr.msk.f32.mxu1 %vm1318_vm0, %v1319_v3 }
 0x12b   :  { %1137 = vmatmul.mubr.f32.gmra.mrb[62].mxu1 %v345_v30 }
 0x12c   :  { %1139 = vmatprep.mubr.msk.f32.mxu1 %vm1318_vm0, %v1319_v3 }
 0x12f   :  { %1140 = vmatmul.mubr.f32.gmra.mrb[64].mxu1 %v346_v38 }
 0x130   :  { %1142 = vmatprep.mubr.msk.f32.mxu1 %vm1318_vm0, %v1319_v3 }
 0x133   :  { %1143 = vmatmul.mubr.f32.gmra.mrb[66].mxu1 %v347_v45 }
 0x134   :  { %1145 = vmatprep.mubr.msk.f32.mxu1 %vm1318_vm0, %v1319_v3 }
 0x137   :  { %1146 = vmatmul.mubr.f32.gmra.mrb[68].mxu1 %v348_v50 }
 0x138   :  { %1148 = vmatprep.mubr.msk.f32.mxu1 %vm1318_vm0, %v1319_v3 }
 0x13b   :  { %1149 = vmatmul.mubr.f32.gmra.mrb[70].mxu1 %v349_v51 }
 0x13c   :  { %1151 = vmatprep.mubr.msk.f32.mxu1 %vm1318_vm0, %v1319_v3 }
 0x13f   :  { %1152 = vmatmul.mubr.f32.gmra.mrb[72].mxu1 %v350_v52 }
 0x1b2   :  { %v440_v54 = vpop.f32.mrb[24].mxu1 }
 0x1b3   :  { %v441_v55 = vadd.f32 %v1742_v53, %v440_v54  ;;  %v1081_v56 = vpop.f32.mrb[25].mxu1 }
 0x1b5   :  { %v564_v57 = vmax.f32 %v441_v55, 0.0 }
 0x1b6   :  { %v445_v58 = vpop.f32.mrb[26].mxu1 }
 0x1b7   :  { %v446_v59 = vadd.f32 %v1742_v53, %v445_v58  ;;  %v1084_v60 = vpop.f32.mrb[27].mxu1  ;;  %1187 = vmatmul.mubr.f32.vlgmr.msra.gmra.mrb[26].mxu0 %v564_v57 }
 0x1b8   :  { %1189 = vmatprep.mubr.msk.f32.mxu0 %vm1318_vm0, %v1319_v3 }
 0x1b9   :  { %v565_v61 = vmax.f32 %v446_v59, 0.0 }
 0x1ba   :  { %v450_v62 = vpop.f32.mrb[28].mxu1 }
 0x1bb   :  { %v451_v63 = vadd.f32 %v1742_v53, %v450_v62  ;;  %v1087_v1 = vpop.f32.mrb[29].mxu1  ;;  %1190 = vmatmul.mubr.f32.gmra.mrb[28].mxu0 %v565_v61 }
 0x1bc   :  { %1192 = vmatprep.mubr.msk.f32.mxu0 %vm1318_vm0, %v1319_v3 }
 0x1bd   :  { %v566_v2 = vmax.f32 %v451_v63, 0.0 }
 0x1be   :  { %v455_v4 = vpop.f32.mrb[30].mxu1 }
 0x1bf   :  { %v456_v5 = vadd.f32 %v1742_v53, %v455_v4  ;;  %v1090_v6 = vpop.f32.mrb[31].mxu1  ;;  %1193 = vmatmul.mubr.f32.gmra.mrb[30].mxu0 %v566_v2 }
 0x1c0   :  { %1195 = vmatprep.mubr.msk.f32.mxu0 %vm1318_vm0, %v1319_v3 }
 0x1c1   :  { %v567_v7 = vmax.f32 %v456_v5, 0.0 }
 0x1c2   :  { %v460_v8 = vpop.f32.mrb[32].mxu1 }
 0x1c3   :  { %v461_v9 = vadd.f32 %v1742_v53, %v460_v8  ;;  %v1093_v10 = vpop.f32.mrb[33].mxu1  ;;  %1196 = vmatmul.mubr.f32.gmra.mrb[32].mxu0 %v567_v7 }
 0x1c4   :  { %1198 = vmatprep.mubr.msk.f32.mxu0 %vm1318_vm0, %v1319_v3 }
 0x1c5   :  { %v568_v11 = vmax.f32 %v461_v9, 0.0 }
 0x1c6   :  { %v465_v12 = vpop.f32.mrb[34].mxu1 }
 0x1c7   :  { %v466_v14 = vadd.f32 %v1742_v53, %v465_v12  ;;  %v1096_v15 = vpop.f32.mrb[35].mxu1  ;;  %1199 = vmatmul.mubr.f32.gmra.mrb[34].mxu0 %v568_v11 }
 0x1c8   :  { %1201 = vmatprep.mubr.msk.f32.mxu0 %vm1318_vm0, %v1319_v3 }
 0x1c9   :  { %v569_v16 = vmax.f32 %v466_v14, 0.0 }
 0x1ca   :  { %v470_v18 = vpop.f32.mrb[36].mxu1 }
 0x1cb   :  { %v471_v19 = vadd.f32 %v1742_v53, %v470_v18  ;;  %v1099_v20 = vpop.f32.mrb[37].mxu1  ;;  %1202 = vmatmul.mubr.f32.gmra.mrb[36].mxu0 %v569_v16 }
 0x1cc   :  { %1204 = vmatprep.mubr.msk.f32.mxu0 %vm1318_vm0, %v1319_v3 }
 0x1cd   :  { %v570_v21 = vmax.f32 %v471_v19, 0.0 }
 0x1ce   :  { %v475_v22 = vpop.f32.mrb[38].mxu1 }
 0x1cf   :  { %v476_v23 = vadd.f32 %v1742_v53, %v475_v22  ;;  %v1102_v25 = vpop.f32.mrb[39].mxu1  ;;  %1205 = vmatmul.mubr.f32.gmra.mrb[38].mxu0 %v570_v21 }
 0x1d0   :  { %1207 = vmatprep.mubr.msk.f32.mxu0 %vm1318_vm0, %v1319_v3 }
 0x1d1   :  { %v571_v26 = vmax.f32 %v476_v23, 0.0 }
 0x1d2   :  { %v480_v27 = vpop.f32.mrb[40].mxu1 }
 0x1d3   :  { %v481_v28 = vadd.f32 %v1742_v53, %v480_v27  ;;  %v1105_v29 = vpop.f32.mrb[41].mxu1  ;;  %1208 = vmatmul.mubr.f32.gmra.mrb[40].mxu0 %v571_v26 }
 0x1d4   :  { %1210 = vmatprep.mubr.msk.f32.mxu0 %vm1318_vm0, %v1319_v3 }
 0x1d5   :  { %v572_v31 = vmax.f32 %v481_v28, 0.0 }
 0x1d6   :  { %v485_v0 = vpop.f32.mrb[42].mxu1 }
 0x1d7   :  { %v486_v32 = vadd.f32 %v1742_v53, %v485_v0  ;;  %v1108_v33 = vpop.f32.mrb[43].mxu1  ;;  %1211 = vmatmul.mubr.f32.gmra.mrb[42].mxu0 %v572_v31 }
 0x1d8   :  { %1213 = vmatprep.mubr.msk.f32.mxu0 %vm1318_vm0, %v1319_v3  ;;  %v1820_v33 = vld [vmem:[%s1928_s6] ss:$0 sm:$0xff] }
 0x1d9   :  { %v573_v34 = vmax.f32 %v486_v32, 0.0 }
 0x1da   :  { %v490_v35 = vpop.f32.mrb[44].mxu1 }
 0x1db   :  { %v491_v36 = vadd.f32 %v1742_v53, %v490_v35  ;;  %v1111_v37 = vpop.f32.mrb[45].mxu1  ;;  %1214 = vmatmul.mubr.f32.gmra.mrb[44].mxu0 %v573_v34 }
 0x1dc   :  { %1216 = vmatprep.mubr.msk.f32.mxu0 %vm1318_vm0, %v1319_v3 }
 0x1dd   :  { %v574_v39 = vmax.f32 %v491_v36, 0.0 }
 0x1de   :  { %v495_v40 = vpop.f32.mrb[46].mxu1 }
 0x1df   :  { %v496_v41 = vadd.f32 %v1742_v53, %v495_v40  ;;  %v1114_v42 = vpop.f32.mrb[47].mxu1  ;;  %1217 = vmatmul.mubr.f32.gmra.mrb[46].mxu0 %v574_v39 }
 0x1e0   :  { %1219 = vmatprep.mubr.msk.f32.mxu0 %vm1318_vm0, %v1319_v3 }
 0x1e1   :  { %v575_v43 = vmax.f32 %v496_v41, 0.0 }
 0x1e2   :  { %v500_v44 = vpop.f32.mrb[48].mxu1 }
 0x1e3   :  { %v501_v46 = vadd.f32 %v1742_v53, %v500_v44  ;;  %v1117_v47 = vpop.f32.mrb[49].mxu1  ;;  %1220 = vmatmul.mubr.f32.gmra.mrb[48].mxu0 %v575_v43 }
 0x1e4   :  { %1222 = vmatprep.mubr.msk.f32.mxu0 %vm1318_vm0, %v1319_v3 }
 0x1e5   :  { %v576_v48 = vmax.f32 %v501_v46, 0.0 }
 0x1e6   :  { %v505_v17 = vpop.f32.mrb[50].mxu1 }
 0x1e7   :  { %v506_v49 = vadd.f32 %v1742_v53, %v505_v17  ;;  %v1120_v24 = vpop.f32.mrb[51].mxu1  ;;  %1223 = vmatmul.mubr.f32.gmra.mrb[50].mxu0 %v576_v48 }
 0x1e8   :  { %1225 = vmatprep.mubr.msk.f32.mxu0 %vm1318_vm0, %v1319_v3 }
 0x1e9   :  { %v577_v13 = vmax.f32 %v506_v49, 0.0 }
 0x1ea   :  { %v510_v30 = vpop.f32.mrb[52].mxu1 }
 0x1eb   :  { %v511_v38 = vadd.f32 %v1742_v53, %v510_v30  ;;  %v1123_v45 = vpop.f32.mrb[53].mxu1  ;;  %1226 = vmatmul.mubr.f32.gmra.mrb[52].mxu0 %v577_v13 }
 0x1ec   :  { %1228 = vmatprep.mubr.msk.f32.mxu0 %vm1318_vm0, %v1319_v3 }
 0x1ed   :  { %v578_v50 = vmax.f32 %v511_v38, 0.0 }
 0x1ee   :  { %v515_v51 = vpop.f32.mrb[54].mxu1 }
 0x1ef   :  { %v516_v52 = vadd.f32 %v1742_v53, %v515_v51  ;;  %v1126_v54 = vpop.f32.mrb[55].mxu1  ;;  %1229 = vmatmul.mubr.f32.gmra.mrb[54].mxu0 %v578_v50 }
 0x1f0   :  { %1231 = vmatprep.mubr.msk.f32.mxu0 %vm1318_vm0, %v1319_v3 }
 0x1f1   :  { %v579_v55 = vmax.f32 %v516_v52, 0.0 }
 0x1f2   :  { %v520_v56 = vpop.f32.mrb[56].mxu1 }
 0x1f3   :  { %v521_v57 = vadd.f32 %v1742_v53, %v520_v56  ;;  %v1129_v58 = vpop.f32.mrb[57].mxu1  ;;  %1232 = vmatmul.mubr.f32.gmra.mrb[56].mxu0 %v579_v55 }
 0x1f4   :  { %1234 = vmatprep.mubr.msk.f32.mxu0 %vm1318_vm0, %v1319_v3 }
 0x1f5   :  { %v580_v59 = vmax.f32 %v521_v57, 0.0 }
 0x1f6   :  { %v525_v60 = vpop.f32.mrb[58].mxu1 }
 0x1f7   :  { %v526_v61 = vadd.f32 %v1742_v53, %v525_v60  ;;  %v1132_v62 = vpop.f32.mrb[59].mxu1  ;;  %1235 = vmatmul.mubr.f32.gmra.mrb[58].mxu0 %v580_v59 }
 0x1f8   :  { %1237 = vmatprep.mubr.msk.f32.mxu0 %vm1318_vm0, %v1319_v3 }
 0x1f9   :  { %v581_v63 = vmax.f32 %v526_v61, 0.0 }
 0x1fa   :  { %v530_v1 = vpop.f32.mrb[60].mxu1 }
 0x1fb   :  { %v531_v2 = vadd.f32 %v1742_v53, %v530_v1  ;;  %v1135_v4 = vpop.f32.mrb[61].mxu1  ;;  %1238 = vmatmul.mubr.f32.gmra.mrb[60].mxu0 %v581_v63 }
 0x1fc   :  { %1240 = vmatprep.mubr.msk.f32.mxu0 %vm1318_vm0, %v1319_v3 }
 0x1fd   :  { %v582_v5 = vmax.f32 %v531_v2, 0.0 }
 0x1fe   :  { %v535_v6 = vpop.f32.mrb[62].mxu1 }
 0x1ff   :  { %v536_v7 = vadd.f32 %v1742_v53, %v535_v6  ;;  %v1138_v8 = vpop.f32.mrb[63].mxu1  ;;  %1241 = vmatmul.mubr.f32.gmra.mrb[62].mxu0 %v582_v5 }
 0x200   :  { %1243 = vmatprep.mubr.msk.f32.mxu0 %vm1318_vm0, %v1319_v3 }
 0x201   :  { %v583_v9 = vmax.f32 %v536_v7, 0.0 }
 0x202   :  { %v540_v10 = vpop.f32.mrb[64].mxu1 }
 0x203   :  { %v541_v11 = vadd.f32 %v1742_v53, %v540_v10  ;;  %v1141_v12 = vpop.f32.mrb[65].mxu1  ;;  %1244 = vmatmul.mubr.f32.gmra.mrb[64].mxu0 %v583_v9 }
 0x204   :  { %1246 = vmatprep.mubr.msk.f32.mxu0 %vm1318_vm0, %v1319_v3 }
 0x205   :  { %v584_v14 = vmax.f32 %v541_v11, 0.0 }
 0x206   :  { %v545_v15 = vpop.f32.mrb[66].mxu1 }
 0x207   :  { %v546_v16 = vadd.f32 %v1742_v53, %v545_v15  ;;  %v1144_v18 = vpop.f32.mrb[67].mxu1  ;;  %1247 = vmatmul.mubr.f32.gmra.mrb[66].mxu0 %v584_v14 }
 0x208   :  { %1249 = vmatprep.mubr.msk.f32.mxu0 %vm1318_vm0, %v1319_v3 }
 0x209   :  { %v585_v19 = vmax.f32 %v546_v16, 0.0 }
 0x20a   :  { %v550_v20 = vpop.f32.mrb[68].mxu1 }
 0x20b   :  { %v551_v21 = vadd.f32 %v1742_v53, %v550_v20  ;;  %v1147_v22 = vpop.f32.mrb[69].mxu1  ;;  %1250 = vmatmul.mubr.f32.gmra.mrb[68].mxu0 %v585_v19 }
 0x20c   :  { %1252 = vmatprep.mubr.msk.f32.mxu0 %vm1318_vm0, %v1319_v3 }
 0x20d   :  { %v586_v23 = vmax.f32 %v551_v21, 0.0 }
 0x20e   :  { %v555_v25 = vpop.f32.mrb[70].mxu1 }
 0x20f   :  { %v556_v26 = vadd.f32 %v1742_v53, %v555_v25  ;;  %v1150_v27 = vpop.f32.mrb[71].mxu1  ;;  %1253 = vmatmul.mubr.f32.gmra.mrb[70].mxu0 %v586_v23 }
 0x210   :  { %1255 = vmatprep.mubr.msk.f32.mxu0 %vm1318_vm0, %v1319_v3 }
 0x211   :  { %v587_v28 = vmax.f32 %v556_v26, 0.0 }
 0x212   :  { %v560_v29 = vpop.f32.mrb[72].mxu1 }
 0x213   :  { %v561_v31 = vadd.f32 %v1742_v53, %v560_v29  ;;  %v1153_v0 = vpop.f32.mrb[73].mxu1  ;;  %1256 = vmatmul.mubr.f32.gmra.mrb[72].mxu0 %v587_v28 }
 0x214   :  { %1258 = vmatprep.mubr.msk.f32.mxu0 %vm1318_vm0, %v1319_v3 }
 0x215   :  { %v588_v32 = vmax.f32 %v561_v31, 0.0 }
 0x217   :  { %1259 = vmatmul.mubr.f32.gmra.mrb[74].mxu0 %v588_v32 }
 0x28a   :  { %v678_v34 = vpop.f32.mrb[26].mxu0 }
 0x28b   :  { %v679_v35 = vadd.f32 %v1820_v33, %v678_v34  ;;  %v1188_v36 = vpop.f32.mrb[27].mxu0 }
 0x28d   :  { %802 = vst [vmem:[%s1929_s7] sm:$0xff] %v679_v35 }
 0x28e   :  { %v683_v53 = vpop.f32.mrb[28].mxu0 }
 0x28f   :  { %v684_v37 = vadd.f32 %v1820_v33, %v683_v53  ;;  %v1191_v39 = vpop.f32.mrb[29].mxu0 }
 0x291   :  { %803 = vst [vmem:[%s1929_s7 + $0x8] sm:$0xff] %v684_v37 }
 0x292   :  { %v688_v3 = vpop.f32.mrb[30].mxu0 }
 0x293   :  { %v689_v40 = vadd.f32 %v1820_v33, %v688_v3  ;;  %v1194_v41 = vpop.f32.mrb[31].mxu0 }
 0x295   :  { %804 = vst [vmem:[%s1929_s7 + $0x10] sm:$0xff] %v689_v40 }
 0x296   :  { %v693_v42 = vpop.f32.mrb[32].mxu0 }
 0x297   :  { %v694_v43 = vadd.f32 %v1820_v33, %v693_v42  ;;  %v1197_v44 = vpop.f32.mrb[33].mxu0 }
 0x299   :  { %805 = vst [vmem:[%s1929_s7 + $0x18] sm:$0xff] %v694_v43 }
 0x29a   :  { %v698_v46 = vpop.f32.mrb[34].mxu0 }
 0x29b   :  { %v699_v47 = vadd.f32 %v1820_v33, %v698_v46  ;;  %v1200_v48 = vpop.f32.mrb[35].mxu0 }
 0x29d   :  { %806 = vst [vmem:[%s1929_s7 + $0x20] sm:$0xff] %v699_v47 }
 0x29e   :  { %v703_v17 = vpop.f32.mrb[36].mxu0 }
 0x29f   :  { %v704_v49 = vadd.f32 %v1820_v33, %v703_v17  ;;  %v1203_v24 = vpop.f32.mrb[37].mxu0 }
 0x2a1   :  { %807 = vst [vmem:[%s1929_s7 + $0x28] sm:$0xff] %v704_v49 }
 0x2a2   :  { %v708_v13 = vpop.f32.mrb[38].mxu0 }
 0x2a3   :  { %v709_v30 = vadd.f32 %v1820_v33, %v708_v13  ;;  %v1206_v38 = vpop.f32.mrb[39].mxu0 }
 0x2a5   :  { %808 = vst [vmem:[%s1929_s7 + $0x30] sm:$0xff] %v709_v30 }
 0x2a6   :  { %v713_v45 = vpop.f32.mrb[40].mxu0 }
 0x2a7   :  { %v714_v50 = vadd.f32 %v1820_v33, %v713_v45  ;;  %v1209_v51 = vpop.f32.mrb[41].mxu0 }
 0x2a9   :  { %809 = vst [vmem:[%s1929_s7 + $0x38] sm:$0xff] %v714_v50 }
 0x2aa   :  { %v718_v52 = vpop.f32.mrb[42].mxu0 }
 0x2ab   :  { %v719_v54 = vadd.f32 %v1820_v33, %v718_v52  ;;  %v1212_v55 = vpop.f32.mrb[43].mxu0 }
 0x2ad   :  { %810 = vst [vmem:[%s1929_s7 + $0x40] sm:$0xff] %v719_v54 }
 0x2ae   :  { %v723_v56 = vpop.f32.mrb[44].mxu0 }
 0x2af   :  { %v724_v57 = vadd.f32 %v1820_v33, %v723_v56  ;;  %v1215_v58 = vpop.f32.mrb[45].mxu0 }
 0x2b1   :  { %811 = vst [vmem:[%s1929_s7 + $0x48] sm:$0xff] %v724_v57 }
 0x2b2   :  { %v728_v59 = vpop.f32.mrb[46].mxu0 }
 0x2b3   :  { %v729_v60 = vadd.f32 %v1820_v33, %v728_v59  ;;  %v1218_v61 = vpop.f32.mrb[47].mxu0 }
 0x2b5   :  { %812 = vst [vmem:[%s1929_s7 + $0x50] sm:$0xff] %v729_v60 }
 0x2b6   :  { %v733_v62 = vpop.f32.mrb[48].mxu0 }
 0x2b7   :  { %v734_v63 = vadd.f32 %v1820_v33, %v733_v62  ;;  %v1221_v1 = vpop.f32.mrb[49].mxu0 }
 0x2b9   :  { %813 = vst [vmem:[%s1929_s7 + $0x58] sm:$0xff] %v734_v63 }
 0x2ba   :  { %v738_v2 = vpop.f32.mrb[50].mxu0 }
 0x2bb   :  { %v739_v4 = vadd.f32 %v1820_v33, %v738_v2  ;;  %v1224_v5 = vpop.f32.mrb[51].mxu0 }
 0x2bd   :  { %814 = vst [vmem:[%s1929_s7 + $0x60] sm:$0xff] %v739_v4 }
 0x2be   :  { %v743_v6 = vpop.f32.mrb[52].mxu0 }
 0x2bf   :  { %v744_v7 = vadd.f32 %v1820_v33, %v743_v6  ;;  %v1227_v8 = vpop.f32.mrb[53].mxu0 }
 0x2c1   :  { %815 = vst [vmem:[%s1929_s7 + $0x68] sm:$0xff] %v744_v7 }
 0x2c2   :  { %v748_v9 = vpop.f32.mrb[54].mxu0 }
 0x2c3   :  { %v749_v10 = vadd.f32 %v1820_v33, %v748_v9  ;;  %v1230_v11 = vpop.f32.mrb[55].mxu0 }
 0x2c5   :  { %816 = vst [vmem:[%s1929_s7 + $0x70] sm:$0xff] %v749_v10 }
 0x2c6   :  { %v753_v12 = vpop.f32.mrb[56].mxu0 }
 0x2c7   :  { %v754_v14 = vadd.f32 %v1820_v33, %v753_v12  ;;  %v1233_v15 = vpop.f32.mrb[57].mxu0 }
 0x2c9   :  { %817 = vst [vmem:[%s1929_s7 + $0x78] sm:$0xff] %v754_v14 }
 0x2ca   :  { %v758_v16 = vpop.f32.mrb[58].mxu0 }
 0x2cb   :  { %v759_v18 = vadd.f32 %v1820_v33, %v758_v16  ;;  %v1236_v19 = vpop.f32.mrb[59].mxu0 }
 0x2cd   :  { %818 = vst [vmem:[%s1929_s7 + $0x80] sm:$0xff] %v759_v18 }
 0x2ce   :  { %v763_v20 = vpop.f32.mrb[60].mxu0 }
 0x2cf   :  { %v764_v21 = vadd.f32 %v1820_v33, %v763_v20  ;;  %v1239_v22 = vpop.f32.mrb[61].mxu0 }
 0x2d1   :  { %819 = vst [vmem:[%s1929_s7 + $0x88] sm:$0xff] %v764_v21 }
 0x2d2   :  { %v768_v23 = vpop.f32.mrb[62].mxu0 }
 0x2d3   :  { %v769_v25 = vadd.f32 %v1820_v33, %v768_v23  ;;  %v1242_v26 = vpop.f32.mrb[63].mxu0 }
 0x2d5   :  { %820 = vst [vmem:[%s1929_s7 + $0x90] sm:$0xff] %v769_v25 }
 0x2d6   :  { %v773_v27 = vpop.f32.mrb[64].mxu0 }
 0x2d7   :  { %v774_v28 = vadd.f32 %v1820_v33, %v773_v27  ;;  %v1245_v29 = vpop.f32.mrb[65].mxu0 }
 0x2d9   :  { %821 = vst [vmem:[%s1929_s7 + $0x98] sm:$0xff] %v774_v28 }
 0x2da   :  { %v778_v31 = vpop.f32.mrb[66].mxu0 }
 0x2db   :  { %v779_v0 = vadd.f32 %v1820_v33, %v778_v31  ;;  %v1248_v32 = vpop.f32.mrb[67].mxu0 }
 0x2dd   :  { %822 = vst [vmem:[%s1929_s7 + $0xa0] sm:$0xff] %v779_v0 }
 0x2de   :  { %v783_v34 = vpop.f32.mrb[68].mxu0 }
 0x2df   :  { %v784_v35 = vadd.f32 %v1820_v33, %v783_v34  ;;  %v1251_v36 = vpop.f32.mrb[69].mxu0 }
 0x2e1   :  { %823 = vst [vmem:[%s1929_s7 + $0xa8] sm:$0xff] %v784_v35 }
 0x2e2   :  { %v788_v53 = vpop.f32.mrb[70].mxu0 }
 0x2e3   :  { %v789_v37 = vadd.f32 %v1820_v33, %v788_v53  ;;  %v1254_v39 = vpop.f32.mrb[71].mxu0 }
 0x2e5   :  { %824 = vst [vmem:[%s1929_s7 + $0xb0] sm:$0xff] %v789_v37 }
 0x2e6   :  { %v793_v3 = vpop.f32.mrb[72].mxu0 }
 0x2e7   :  { %v794_v40 = vadd.f32 %v1820_v33, %v793_v3  ;;  %v1257_v41 = vpop.f32.mrb[73].mxu0 }
 0x2e9   :  { %825 = vst [vmem:[%s1929_s7 + $0xb8] sm:$0xff] %v794_v40 }
 0x2ea   :  { %v798_v42 = vpop.f32.mrb[74].mxu0 }
 0x2eb   :  { %v799_v43 = vadd.f32 %v1820_v33, %v798_v42  ;;  %v1260_v44 = vpop.f32.mrb[75].mxu0 }
 0x2ed   :  { %826 = vst [vmem:[%s1929_s7 + $0xc0] sm:$0xff] %v799_v43 }

</bundles_post_ra>
